<compile_context>
chip_gen: v7x
topology: tpu7x:2x2x1
jax: 0.10.0
libtpu: 0.0.40
codegen_flags: <defaults>
</compile_context>

<pallas_src>
import jax
import jax.numpy as jnp
from jax.experimental import pallas as pl
from jax.experimental.pallas import tpu as pltpu


_LANE = 128
_SUBLANE = 8


def _round_up(x: int, m: int) -> int:
    return ((x + m - 1) // m) * m


def _make_kernel(modes, project: bool, has_idx: bool):
    """Build the kernel body.

    Ref order:
      [idx_ref (only if some factor uses the one-hot path)]
      + one ref per indexed factor:
          'onehot'   -> whole (dim_pad_i, Kp) table, resident in VMEM
          'gathered' -> pre-gathered (TB, Kp) row tile (tiled over batch)
      + [last factor (Dp, Kp) if project]
      + out_ref.
    """
    n_idx = len(modes)

    def kernel(*refs):
        pos = 0
        idx_tile = None
        if has_idx:
            idx_tile = refs[0][...]                           # (tb, n_idx) i32
            pos = 1
        factor_refs = refs[pos:pos + n_idx]
        pos += n_idx
        last_ref = refs[pos] if project else None
        out_ref = refs[-1]

        tb = out_ref.shape[0]

        prod = None
        for i, mode in enumerate(modes):  # static python loop, unrolled
            f_ref = factor_refs[i]
            if mode == "gathered":
                rows = f_ref[...]                             # (tb, Kp) f32
            else:
                dim_i = f_ref.shape[0]
                idx_col = idx_tile[:, i:i + 1]                # (tb, 1) int32
                onehot = (
                    idx_col
                    == jax.lax.broadcasted_iota(jnp.int32, (tb, dim_i), 1)
                ).astype(jnp.float32)
                rows = jnp.dot(onehot, f_ref[...],
                               preferred_element_type=jnp.float32)
            prod = rows if prod is None else prod * rows

        if project:
            # prod @ last.T  ==  dot_general contracting on K (lane axis).
            # TODO(synk): if dims[-1] grows very large, add a second grid axis
            #             over output columns with prod cached in VMEM scratch.
            out_ref[...] = jax.lax.dot_general(
                prod,
                last_ref[...],
                dimension_numbers=(((1,), (1,)), ((), ())),
                preferred_element_type=jnp.float32,
            )
        else:
            # (TB, 1) output is a masked 1-lane store; write volume is tiny
            # (4 bytes/row) so a lane-dense slab layout is not worth the
            # extra in-kernel relayout.
            out_ref[...] = jnp.sum(prod, axis=-1, keepdims=True)

    return kernel


def value_parafac(indices, factors, *, block_b: int = 512,
                  gather_dim_threshold: int = 128):
    """Pallas implementation of ValuePARAFAC.forward."""
    indices = indices.astype(jnp.int32)
    bsz, n_idx = indices.shape
    n_factors = len(factors)
    assert 1 <= n_idx <= n_factors
    project = n_idx < n_factors

    k = factors[0].shape[1]
    k_pad = _round_up(k, _LANE)

    # Batch tiling: tb is a multiple of 8 (sublane), b_pad a multiple of tb.
    tb = min(_round_up(block_b, _SUBLANE), _round_up(bsz, _SUBLANE))
    b_pad = _round_up(bsz, tb)
    num_tiles = b_pad // tb

    modes = tuple(
        "gathered" if factors[i].shape[0] > gather_dim_threshold else "onehot"
        for i in range(n_idx)
    )
    has_idx = any(m == "onehot" for m in modes)

    args = []
    in_specs = []

    if has_idx:
        # Pad batch with index 0 (always valid); padded rows are sliced off.
        idx_pad = jnp.zeros((b_pad, n_idx), jnp.int32).at[:bsz].set(indices)
        args.append(idx_pad)
        in_specs.append(pl.BlockSpec((tb, n_idx), lambda i: (i, 0)))

    for fi, mode in enumerate(modes):
        f = factors[fi].astype(jnp.float32)
        dim_i = f.shape[0]
        if mode == "gathered":
            # Wrapper-side row gather: kernel input bytes are B*Kp*4,
            # independent of dim_i; tiled over batch with the grid.
            rows = f[indices[:, fi], :]                       # (bsz, k)
            rows = jnp.zeros((b_pad, k_pad), jnp.float32).at[:bsz, :k].set(rows)
            args.append(rows)
            in_specs.append(pl.BlockSpec((tb, k_pad), lambda i: (i, 0)))
        else:
            # Small table: keep whole factor resident; pad K to lane multiple
            # and dim_i to sublane multiple (padded rows are never selected
            # because real indices are < dim_i and padded indices are 0).
            dim_pad = _round_up(dim_i, _SUBLANE)
            f_p = jnp.zeros((dim_pad, k_pad), jnp.float32).at[:dim_i, :k].set(f)
            args.append(f_p)
            in_specs.append(pl.BlockSpec((dim_pad, k_pad), lambda i: (0, 0)))

    if project:
        out_dim = factors[-1].shape[0]
        out_dim_pad = _round_up(out_dim, _LANE)
        last = factors[-1].astype(jnp.float32)
        last_p = (
            jnp.zeros((out_dim_pad, k_pad), jnp.float32)
            .at[:out_dim, :k].set(last)
        )
        args.append(last_p)
        in_specs.append(pl.BlockSpec((out_dim_pad, k_pad), lambda i: (0, 0)))
        out_shape = (b_pad, out_dim_pad)
        out_spec = pl.BlockSpec((tb, out_dim_pad), lambda i: (i, 0))
    else:
        out_shape = (b_pad, 1)
        out_spec = pl.BlockSpec((tb, 1), lambda i: (i, 0))

    kernel = _make_kernel(modes, project, has_idx)

    out = pl.pallas_call(
        kernel,
        out_shape=jax.ShapeDtypeStruct(out_shape, jnp.float32),
        grid=(num_tiles,),
        in_specs=in_specs,
        out_specs=out_spec,
        compiler_params=pltpu.CompilerParams(
            # Batch axis is independent across tiles -> shard across
            # TensorCores on v7x, plain pipelined loop on v5e/v6e.
            dimension_semantics=("parallel",),
            # Headroom under v7x's 64 MiB physical VMEM; also comfortably
            # above the default scoped limits on v5e/v6e for the resident
            # factor tables plus double-buffered batch tiles.
            vmem_limit_bytes=48 * 1024 * 1024,
        ),
    )(*args)

    if project:
        return out[:bsz, :out_dim]
    return out[:bsz, 0]


def value_parafac_reference(indices, factors):
    """Plain-JAX reference mirroring the PyTorch forward (in float32)."""
    bsz, n_idx = indices.shape
    k = factors[0].shape[1]
    prod = jnp.ones((bsz, k), dtype=jnp.float32)
    for i in range(n_idx):
        prod = prod * factors[i].astype(jnp.float32)[indices[:, i], :]
    if n_idx < len(factors):
        return prod @ factors[-1].astype(jnp.float32).T
    return jnp.sum(prod, axis=-1)


def init_factors(key, dims, k, scale=1.0, bias=0.0):
    """Deterministic parameter init: scale * (randn(dim, k) + bias)."""
    factors = []
    keys = jax.random.split(key, len(dims))
    for sub, dim in zip(keys, dims):
        factors.append(
            scale * (jax.random.normal(sub, (dim, k), dtype=jnp.float32) + bias)
        )
    return factors


def _rand_indices(key, dims, n_idx, bsz):
    return jnp.stack(
        [
            jax.random.randint(jax.random.fold_in(key, i), (bsz,), 0, dims[i])
            for i in range(n_idx)
        ],
        axis=1,
    ).astype(jnp.int32)


if __name__ == "__main__":
    key = jax.random.PRNGKey(0)
    k_params, k_idx = jax.random.split(key)

    # --- Case 1: small dims, partial indexing (projection), batch padding ---
    dims = (9, 7, 11)
    k = 5
    bsz = 13
    factors = init_factors(k_params, dims, k)
    idx_partial = _rand_indices(k_idx, dims, len(dims) - 1, bsz)
    out = jax.block_until_ready(value_parafac(idx_partial, factors))
    ref = value_parafac_reference(idx_partial, factors)
    assert out.shape == (bsz, dims[-1])
    assert jnp.allclose(out, ref, atol=1e-4, rtol=1e-4)

    # --- Case 2: small dims, full indexing (sum over K) ---
    idx_full = _rand_indices(jax.random.fold_in(k_idx, 100), dims, len(dims), bsz)
    out = jax.block_until_ready(value_parafac(idx_full, factors))
    ref = value_parafac_reference(idx_full, factors)
    assert out.shape == (bsz,)
    assert jnp.allclose(out, ref, atol=1e-4, rtol=1e-4)

    # --- Case 3: mixed large/small dims, multi-tile batch grid, projection ---
    dims3 = (260, 7, 11)          # factor 0 -> wrapper gather, factor 1 -> one-hot
    bsz3 = 24
    factors3 = init_factors(jax.random.fold_in(k_params, 3), dims3, k)
    idx3 = _rand_indices(jax.random.fold_in(k_idx, 3), dims3, len(dims3) - 1, bsz3)
    out3 = jax.block_until_ready(value_parafac(idx3, factors3, block_b=8))
    ref3 = value_parafac_reference(idx3, factors3)
    assert out3.shape == (bsz3, dims3[-1])
    assert jnp.allclose(out3, ref3, atol=1e-4, rtol=1e-4)

    # --- Case 4: all-large dims, full indexing, no in-kernel index ref ---
    dims4 = (200, 300)
    bsz4 = 16
    factors4 = init_factors(jax.random.fold_in(k_params, 4), dims4, k)
    idx4 = _rand_indices(jax.random.fold_in(k_idx, 4), dims4, len(dims4), bsz4)
    out4 = jax.block_until_ready(value_parafac(idx4, factors4))
    ref4 = value_parafac_reference(idx4, factors4)
    assert out4.shape == (bsz4,)
    assert jnp.allclose(out4, ref4, atol=1e-4, rtol=1e-4)

    print("KERNEL_OK")
</pallas_src>

<mosaic_0001>
module attributes {stable_mosaic.version = 11 : i64} {
  func.func @kernel(%arg0: i32, %arg1: memref<16x2xi32, #tpu.memory_space<vmem>>, %arg2: memref<16x128xf32, #tpu.memory_space<vmem>>, %arg3: memref<8x128xf32, #tpu.memory_space<vmem>>, %arg4: memref<128x128xf32, #tpu.memory_space<vmem>>, %arg5: memref<16x128xf32, #tpu.memory_space<vmem>>) attributes {dimension_semantics = [#tpu.dimension_semantics<parallel>], iteration_bounds = array<i64: 1>, scalar_prefetch = 0 : i64, scratch_operands = 0 : i64, tpu.core_type = #tpu.core_type<tc>, window_params = [{transform_indices = @transform_0, window_bounds = array<i64: 16, 2>}, {pipeline_mode = #tpu.pipeline_mode<synchronous>, transform_indices = @transform_1, window_bounds = array<i64: 16, 128>}, {pipeline_mode = #tpu.pipeline_mode<synchronous>, transform_indices = @transform_2, window_bounds = array<i64: 8, 128>}, {pipeline_mode = #tpu.pipeline_mode<synchronous>, transform_indices = @transform_3, window_bounds = array<i64: 128, 128>}, {transform_indices = @transform_4, window_bounds = array<i64: 16, 128>}]} {
    %c0 = arith.constant 0 : index
    %c0_0 = arith.constant 0 : index
    %0 = vector.load %arg1[%c0, %c0_0] : memref<16x2xi32, #tpu.memory_space<vmem>>, vector<16x2xi32>
    %1 = vector.extract_strided_slice %0 {offsets = [0, 0], sizes = [16, 1], strides = [1, 1]} : vector<16x2xi32> to vector<16x1xi32>
    %2 = tpu.iota {dimensions = array<i32: 1>} : vector<16x16xi32>
    %3 = vector.broadcast %1 : vector<16x1xi32> to vector<16x16xi32>
    %4 = arith.cmpi eq, %3, %2 : vector<16x16xi32>
    %5 = arith.extui %4 : vector<16x16xi1> to vector<16x16xi32>
    %6 = arith.sitofp %5 : vector<16x16xi32> to vector<16x16xf32>
    %c0_1 = arith.constant 0 : index
    %c0_2 = arith.constant 0 : index
    %7 = vector.load %arg2[%c0_1, %c0_2] : memref<16x128xf32, #tpu.memory_space<vmem>>, vector<16x128xf32>
    %cst = arith.constant dense<0.000000e+00> : vector<16x128xf32>
    %8 = tpu.matmul %6, %7, %cst {dimension_numbers = #tpu.dot_dimension_numbers<[1], [0], [0], [1], [0, 0, 1, 1], [], []>} : vector<16x16xf32>, vector<16x128xf32>, vector<16x128xf32> -> vector<16x128xf32>
    %9 = vector.extract_strided_slice %0 {offsets = [0, 1], sizes = [16, 1], strides = [1, 1]} : vector<16x2xi32> to vector<16x1xi32>
    %10 = tpu.iota {dimensions = array<i32: 1>} : vector<16x8xi32>
    %11 = vector.broadcast %9 : vector<16x1xi32> to vector<16x8xi32>
    %12 = arith.cmpi eq, %11, %10 : vector<16x8xi32>
    %13 = arith.extui %12 : vector<16x8xi1> to vector<16x8xi32>
    %14 = arith.sitofp %13 : vector<16x8xi32> to vector<16x8xf32>
    %c0_3 = arith.constant 0 : index
    %c0_4 = arith.constant 0 : index
    %15 = vector.load %arg3[%c0_3, %c0_4] : memref<8x128xf32, #tpu.memory_space<vmem>>, vector<8x128xf32>
    %cst_5 = arith.constant dense<0.000000e+00> : vector<16x128xf32>
    %16 = tpu.matmul %14, %15, %cst_5 {dimension_numbers = #tpu.dot_dimension_numbers<[1], [0], [0], [1], [0, 0, 1, 1], [], []>} : vector<16x8xf32>, vector<8x128xf32>, vector<16x128xf32> -> vector<16x128xf32>
    %17 = arith.mulf %8, %16 : vector<16x128xf32>
    %c0_6 = arith.constant 0 : index
    %c0_7 = arith.constant 0 : index
    %18 = vector.load %arg4[%c0_6, %c0_7] : memref<128x128xf32, #tpu.memory_space<vmem>>, vector<128x128xf32>
    %cst_8 = arith.constant dense<0.000000e+00> : vector<16x128xf32>
    %19 = tpu.matmul %17, %18, %cst_8 {dimension_numbers = #tpu.dot_dimension_numbers<[1], [1], [0], [0], [0, 0, 1, 0], [], []>} : vector<16x128xf32>, vector<128x128xf32>, vector<16x128xf32> -> vector<16x128xf32>
    %c0_9 = arith.constant 0 : index
    %c0_10 = arith.constant 0 : index
    %20 = vector.load %arg5[%c0_9, %c0_10] : memref<16x128xf32, #tpu.memory_space<vmem>>, vector<16x128xf32>
    tpu.vector_store %arg5[%c0_9, %c0_10], %19 {strides = array<i32>} : memref<16x128xf32, #tpu.memory_space<vmem>>, vector<16x128xf32>,
    return
  }
  func.func @transform_0(%arg0: i32) -> (i32, i32) {
    %c0_i32 = arith.constant 0 : i32
    %c0_i32_0 = arith.constant 0 : i32
    return %arg0, %c0_i32 : i32, i32
  }
  func.func @transform_1(%arg0: i32) -> (i32, i32) {
    %c0_i32 = arith.constant 0 : i32
    %c0_i32_0 = arith.constant 0 : i32
    %c0_i32_1 = arith.constant 0 : i32
    return %c0_i32, %c0_i32_0 : i32, i32
  }
  func.func @transform_2(%arg0: i32) -> (i32, i32) {
    %c0_i32 = arith.constant 0 : i32
    %c0_i32_0 = arith.constant 0 : i32
    %c0_i32_1 = arith.constant 0 : i32
    return %c0_i32, %c0_i32_0 : i32, i32
  }
  func.func @transform_3(%arg0: i32) -> (i32, i32) {
    %c0_i32 = arith.constant 0 : i32
    %c0_i32_0 = arith.constant 0 : i32
    %c0_i32_1 = arith.constant 0 : i32
    return %c0_i32, %c0_i32_0 : i32, i32
  }
  func.func @transform_4(%arg0: i32) -> (i32, i32) {
    %c0_i32 = arith.constant 0 : i32
    %c0_i32_0 = arith.constant 0 : i32
    return %arg0, %c0_i32 : i32, i32
  }
}

</mosaic_0001>

<bundles_post_ra>
// kernel: tpu_custom_call.1
= control target key start
LH: loop header
LB: loop body
LE: loop exit
PB: predicated region body
PF: predicated region fallthrough
CT: control target
= control target key end

     0   :  { %9 = vsyncpa [#allocation3], 0  ;;  %s590_s0 = inlined_call_operand.vmem [shape: s32[16,2], index: 0, kind: input, shape index: {}]   ;;  %s591_s1 = inlined_call_operand.vmem [shape: f32[16,128], index: 1, kind: input, shape index: {}]   ;;  %s592_s2 = inlined_call_operand.vmem [shape: f32[8,128], index: 2, kind: input, shape index: {}]   ;;  %s593_s3 = inlined_call_operand.hbm [shape: f32[128,128], index: 3, kind: input, shape index: {}]   ;;  %s594_s4 = inlined_call_operand.hbm [shape: f32[16,128], index: 4, kind: output, shape index: {}]  }
   0x1   :  { %10 = vsyncpa [#allocation4], 0  ;;  %s513_s15 = smov [#allocation2]   ;;  %s465_s19 = scalar_lea.hbm %s593_s3, 2048 }
   0x2   :  { %s22_s16 = sshll.u32 %s513_s15, 4  ;;  %p466_p0 = scmp.ne.s32.totalorder %s593_s3, %s465_s19  ;;  %s23_s16 = int_to_ptr.vmem [resolvable:$true] %s22_s16 }
   0x3   :  { %p469_p1 = scmp.lt.u32.totalorder %s465_s19, %s593_s3 }
   0x5   :  { %p471_p2 = pnand %p469_p1, %p466_p0 }
   0x7   :  { %474 = shalt.err (!%p471_p2)
}
   0x8   :  { %s475_s24 = scalar_lea.vmem %s23_s16, 2048  ;;  %p480_p4 = scmp.lt.s32.totalorder %s23_s16, %s23_s16 }
   0x9   :  { %p476_p3 = scmp.ne.s32.totalorder %s23_s16, %s475_s24  ;;  %p481_p5 = scmp.lt.s32.totalorder %s475_s24, %s475_s24 }
   0xb   :  { %p482_p6 = por %p481_p5, %p480_p4 }
   0xd   :  { %p483_p7 = pnand %p482_p6, %p476_p3 }
   0xf   :  { %486 = shalt.err (!%p483_p7)
}
  0x10   :  { %s514_s25 = smov 128   ;;  %s515_s26 = smov 8  }
  0x11   :  { %28 = dma.hbm_to_vmem [thread:$0]  %s593_s3, 2048, %s23_s16, [#allocation3], %s514_s25, %s514_s25, %s515_s26  }
  0x12   :  { %509 = dma.done.wait [#allocation3], 2048  }
  0x13   :  { %510 = vsyncadd [#allocation3], 4294965248  ;;  %v516_v0 = vmov 1   ;;  %v517_v1 = vmov 0   ;;  %v32_v2 = vld [vmem:[%s590_s0] sm:$0xff]  ;;  %v49_v4 = vld [vmem:[%s591_s1 + $0x8] sm:$0xff]  ;;  %v34_v29 = vlaneseq }
  0x14   :  { %463 = vset.pattern.permute.xlu1 %v516_v0  ;;  %462 = vset.pattern.permute.xlu0 %v517_v1  ;;  %v48_v3 = vld [vmem:[%s591_s1] sm:$0xff]  ;;  %v33_v5 = vld [vmem:[%s590_s0 + $0x8] sm:$0xff]  ;;  %v230_v9 = vld [vmem:[#allocation2 + $0x8] sm:$0xff]  ;;  %vm50_vm0 = vcmask 130048   ;;  %v518_v33 = vmov 0.0   ;;  %vm145_vm4 = vcmask 64512  }
  0x15   :  { %133 = vperm.xlu1 %463, %v32_v2   ;;  %37 = vperm.xlu0 %462, %v32_v2   ;;  %v419_v6 = vpack.c.bf16 %v49_v4, %v48_v3  ;;  %v144_v7 = vld [vmem:[%s592_s2] sm:$0xff]  ;;  %v229_v8 = vld [vmem:[#allocation2] sm:$0xff]  ;;  %v231_v10 = vld [vmem:[#allocation2 + $0x10] sm:$0xff]  ;;  %v35_v30 = vand.u32 127, %v34_v29  ;;  %s519_s0 = smov [#allocation5]  }
  0x16   :  { %v423_v11 = vpack.c.bf16 %v230_v9, %v229_v8  ;;  %v232_v12 = vld [vmem:[#allocation2 + $0x18] sm:$0xff]  ;;  %v233_v14 = vld [vmem:[#allocation2 + $0x20] sm:$0xff]  ;;  %v234_v15 = vld [vmem:[#allocation2 + $0x28] sm:$0xff]  ;;  %s327_s1 = sshll.u32 %s519_s0, 4  ;;  %s328_s1 = int_to_ptr.vmem [resolvable:$true] %s327_s1 }
  0x17   :  { %420 = vmatprep.subr.bf16.mxu0 %v419_v6  ;;  %v427_v13 = vpack.c.bf16 %v232_v12, %v231_v10  ;;  %v431_v16 = vpack.c.bf16 %v234_v15, %v233_v14  ;;  %v235_v17 = vld [vmem:[#allocation2 + $0x30] sm:$0xff]  ;;  %v236_v18 = vld [vmem:[#allocation2 + $0x38] sm:$0xff]  ;;  %v237_v20 = vld [vmem:[#allocation2 + $0x40] sm:$0xff]  ;;  %s487_s2 = scalar_lea.vmem %s328_s1, 256  ;;  %p492_p9 = scmp.lt.s32.totalorder %s328_s1, %s328_s1 }
  0x18   :  { %422 = vmatpush3.bf16.msra.mxu0 %v419_v6  ;;  %424 = vmatprep.subr.bf16.mxu1 %v423_v11  ;;  %v435_v19 = vpack.c.bf16 %v236_v18, %v235_v17  ;;  %v238_v21 = vld [vmem:[#allocation2 + $0x48] sm:$0xff]  ;;  %v239_v23 = vld [vmem:[#allocation2 + $0x50] sm:$0xff]  ;;  %v240_v24 = vld [vmem:[#allocation2 + $0x58] sm:$0xff]  ;;  %p488_p8 = scmp.ne.s32.totalorder %s328_s1, %s487_s2  ;;  %p493_p10 = scmp.lt.s32.totalorder %s487_s2, %s487_s2 }
  0x19   :  { %136 = vperm.xlu1 %463, %v33_v5   ;;  %40 = vperm.xlu0 %462, %v33_v5   ;;  %v439_v22 = vpack.c.bf16 %v238_v21, %v237_v20  ;;  %v443_v25 = vpack.c.bf16 %v240_v24, %v239_v23  ;;  %v241_v26 = vld [vmem:[#allocation2 + $0x60] sm:$0xff]  ;;  %v242_v27 = vld [vmem:[#allocation2 + $0x68] sm:$0xff]  ;;  %v243_v40 = vld [vmem:[#allocation2 + $0x70] sm:$0xff] }
  0x1a   :  { %379 = vmatprep.subr.mxu0 %v144_v7  ;;  %426 = vmatpush3.bf16.xpose.msra.mxu1 %v423_v11  ;;  %v447_v28 = vpack.c.bf16 %v242_v27, %v241_v26  ;;  %v244_v41 = vld [vmem:[#allocation2 + $0x78] sm:$0xff]  ;;  %p494_p11 = por %p493_p10, %p492_p9 }
  0x1b   :  { %428 = vmatprep.subr.bf16.mxu1 %v427_v13  ;;  %v451_v42 = vpack.c.bf16 %v244_v41, %v243_v40 }
  0x1c   :  { %p495_p12 = pnand %p494_p11, %p488_p8 }
  0x1d   :  { %464 = vset.pattern.permute.xlu0 %v516_v0 }
  0x22   :  { %430 = vmatpush3.bf16.xpose.msra.mxu1 %v427_v13 }
  0x23   :  { %432 = vmatprep.subr.bf16.mxu1 %v431_v16 }
  0x2a   :  { %434 = vmatpush3.bf16.xpose.msra.mxu1 %v431_v16 }
  0x2b   :  { %436 = vmatprep.subr.bf16.mxu1 %v435_v19 }
  0x32   :  { %438 = vmatpush3.bf16.xpose.msra.mxu1 %v435_v19 }
  0x33   :  { %440 = vmatprep.subr.bf16.mxu1 %v439_v22 }
  0x3a   :  { %442 = vmatpush3.bf16.xpose.msra.mxu1 %v439_v22 }
  0x3b   :  { %444 = vmatprep.subr.bf16.mxu1 %v443_v25 }
  0x42   :  { %446 = vmatpush3.bf16.xpose.msra.mxu1 %v443_v25 }
  0x43   :  { %448 = vmatprep.subr.bf16.mxu1 %v447_v28 }
  0x4a   :  { %450 = vmatpush3.bf16.xpose.msra.mxu1 %v447_v28 }
  0x4b   :  { %452 = vmatprep.subr.bf16.mxu1 %v451_v42 }
  0x52   :  { %454 = vmatpush3.bf16.xpose.msra.mxu1 %v451_v42 }
  0x94   :  { %v134_v31 = vpop.permute.xlu1 %133  ;;  %v38_v32 = vpop.permute.xlu0 %37 }
  0x95   :  { %vm42_vm1 = vcmp.eq.s32.totalorder %v38_v32, %v35_v30  ;;  %vm138_vm2 = vcmp.eq.s32.totalorder %v134_v31, %v35_v30 }
  0x96   :  { %v339_v34 = vsel %vm42_vm1, 1.0, %v518_v33  ;;  %v343_v37 = vsel %vm138_vm2, 1.0, %v518_v33 }
  0x97   :  { %376 = vmatprep.mubr.msk.f32.mxu0 %vm50_vm0, %v339_v34 }
  0x98   :  { %v137_v35 = vpop.permute.xlu1 %136  ;;  %v41_v36 = vpop.permute.xlu0 %40 }
  0x99   :  { %vm43_vm3 = vcmp.eq.s32.totalorder %v41_v36, %v35_v30  ;;  %vm139_vm5 = vcmp.eq.s32.totalorder %v137_v35, %v35_v30 }
  0x9a   :  { %v340_v38 = vsel %vm43_vm3, 1.0, %v518_v33  ;;  %v344_v39 = vsel %vm139_vm5, 1.0, %v518_v33 }
  0x9b   :  { %377 = vmatmul.mubr.msk.f32.vlgmr.msra.gmra.mrb[0].mxu0 %vm50_vm0, %v340_v38 }
  0x9c   :  { %380 = vmatpush3.msra.mxu0 %v144_v7  ;;  %381 = vmatprep.mubr.msk.f32.mxu0 %vm145_vm4, %v343_v37 }
  0x9f   :  { %382 = vmatmul.mubr.msk.f32.vlgmr.msra.gmra.mrb[2].mxu0 %vm145_vm4, %v344_v39 }
 0x16e   :  { %v378_v43 = vpop.f32.mrb[0].mxu0 }
 0x16f   :  { %v123_v44 = vpop.f32.mrb[1].mxu0 }
 0x172   :  { %v383_v45 = vpop.f32.mrb[2].mxu0 }
 0x173   :  { %v228_v46 = vmul.f32 %v383_v45, %v378_v43  ;;  %v218_v47 = vpop.f32.mrb[3].mxu0 }
 0x174   :  { %v227_v48 = vmul.f32 %v218_v47, %v123_v44 }
 0x176   :  { %416 = vmatprep.mubr.f32.mxu1 %v227_v48 }
 0x177   :  { %417 = vmatmul.mubr.f32.vlgmr.msra.gmra.mrb[0].mxu1 %v228_v46 }
 0x24a   :  { %v418_v49 = vpop.f32.mrb[0].mxu1 }
 0x24b   :  { %321 = vst [vmem:[#allocation5 + $0x8] sm:$0xff] %v418_v49  ;;  %v311_v50 = vpop.f32.mrb[1].mxu1 }
 0x24c   :  { %320 = vst [vmem:[#allocation5] sm:$0xff] %v311_v50 }
 0x24d   :  { %498 = shalt.err (!%p495_p12)
}
 0x24e   :  { %s499_s14 = scalar_lea.hbm %s594_s4, 256 }
 0x24f   :  { %p500_p13 = scmp.ne.s32.totalorder %s594_s4, %s499_s14  ;;  %p503_p0 = scmp.lt.u32.totalorder %s499_s14, %s594_s4 }
 0x251   :  { %p505_p1 = pnand %p503_p0, %p500_p13 }
 0x253   :  { %508 = shalt.err (!%p505_p1)
}
 0x254   :  { %333 = dma.vmem_to_hbm [thread:$0]  %s328_s1, 256, %s594_s4, [#allocation4], %s514_s25, %s514_s25, %s515_s26  }
 0x255   :  { %511 = dma.done.wait [#allocation4], 256  }
 0x256   :  { %512 = vsyncadd [#allocation4], 4294967040 }
 0x257   :  { %337 = vsyncpa [#allocation3], 1 }
 0x258   :  { %338 = vsyncpa [#allocation4], 1 }

</bundles_post_ra>
